<compile_context>
chip_gen: v5e
topology: v5e:2x2
jax: 0.10.0
libtpu: 0.0.40
codegen_flags: <defaults>
</compile_context>

<pallas_src>
import functools
import math

import jax
import jax.numpy as jnp
from jax.experimental import pallas as pl
from jax.experimental.pallas import tpu as pltpu

_VMEM_LIMIT = 48 * 1024 * 1024  # safe on v5e/v6e (128 MiB) and v7x (64 MiB) VMEM


def _round_up(x, m):
    return (x + m - 1) // m * m


# ---------------------------------------------------------------------------
# Linear kernel: o = x @ W + b   (used for w_q, w_k, w_v, w_o)
# ---------------------------------------------------------------------------
def _linear_kernel(x_ref, w_ref, b_ref, o_ref):
    o_ref[...] = (
        jnp.dot(x_ref[...], w_ref[...], preferred_element_type=jnp.float32)
        + b_ref[...]
    ).astype(o_ref.dtype)


def _linear(x2, w, b, *, block_m=128):
    """x2: (M, D), w: (D, N), b: (N,) -> (M, N)."""
    M, D = x2.shape
    N = w.shape[1]
    bm = min(block_m, _round_up(M, 8))
    Mp = _round_up(M, bm)
    if Mp != M:
        x2 = jnp.pad(x2, ((0, Mp - M), (0, 0)))
    b2 = b.reshape(1, N)

    cost = pl.CostEstimate(
        flops=2 * Mp * D * N,
        transcendentals=0,
        bytes_accessed=(Mp * D + D * N + N + Mp * N) * x2.dtype.itemsize,
    )
    out = pl.pallas_call(
        _linear_kernel,
        out_shape=jax.ShapeDtypeStruct((Mp, N), x2.dtype),
        grid_spec=pltpu.PrefetchScalarGridSpec(
            num_scalar_prefetch=0,
            grid=(Mp // bm,),
            in_specs=[
                pl.BlockSpec((bm, D), lambda i: (i, 0)),  # token rows
                pl.BlockSpec((D, N), lambda i: (0, 0)),   # full weight (D x D)
                pl.BlockSpec((1, N), lambda i: (0, 0)),   # bias row
            ],
            out_specs=pl.BlockSpec((bm, N), lambda i: (i, 0)),
        ),
        compiler_params=pltpu.CompilerParams(
            dimension_semantics=("parallel",),
            vmem_limit_bytes=_VMEM_LIMIT,
        ),
        cost_estimate=cost,
    )(x2, w, b2)
    return out[:M]


# ---------------------------------------------------------------------------
# Flash attention kernel (online softmax, accumulator resident across kv axis)
# ---------------------------------------------------------------------------
def _flash_kernel(q_ref, k_ref, v_ref, o_ref, m_sc, l_sc, acc_sc, *,
                  scale, kv_len, needs_kv_mask):
    ki = pl.program_id(2)

    @pl.when(ki == 0)
    def _():
        m_sc[...] = jnp.full_like(m_sc, -jnp.inf)
        l_sc[...] = jnp.zeros_like(l_sc)
        acc_sc[...] = jnp.zeros_like(acc_sc)

    q = q_ref[0]  # (tq, dk)
    k = k_ref[0]  # (tk, dk)
    v = v_ref[0]  # (tk, dk)

    s = jax.lax.dot_general(
        q, k, (((1,), (1,)), ((), ())), preferred_element_type=jnp.float32
    ) * scale  # (tq, tk)

    if needs_kv_mask:  # static: only emitted when the kv axis was padded
        tk = s.shape[-1]
        col = ki * tk + jax.lax.broadcasted_iota(jnp.int32, s.shape, 1)
        s = jnp.where(col < kv_len, s, -1e9)

    m_prev = m_sc[0]                                        # (tq, 1)
    m_new = jnp.maximum(m_prev, s.max(axis=-1, keepdims=True))
    alpha = jnp.exp(m_prev - m_new)
    p = jnp.exp(s - m_new)
    l_sc[0] = alpha * l_sc[0] + p.sum(axis=-1, keepdims=True)
    acc_sc[0] = alpha * acc_sc[0] + jnp.dot(
        p.astype(v.dtype), v, preferred_element_type=jnp.float32)
    m_sc[0] = m_new

    @pl.when(ki == pl.num_programs(2) - 1)
    def _():
        o_ref[0] = (acc_sc[0] / l_sc[0]).astype(o_ref.dtype)


def _flash_attention(q, k, v, *, block_q=128, block_k=128):
    """q: (BH, Sq, dk), k/v: (BH, Sk, dk) -> (BH, Sq, dk)."""
    BH, Sq, dk = q.shape
    Sk = k.shape[1]
    scale = 1.0 / math.sqrt(dk)

    tq = min(block_q, _round_up(Sq, 8))
    tk = min(block_k, _round_up(Sk, 8))
    Sqp = _round_up(Sq, tq)
    Skp = _round_up(Sk, tk)
    if Sqp != Sq:
        q = jnp.pad(q, ((0, 0), (0, Sqp - Sq), (0, 0)))
    if Skp != Sk:
        k = jnp.pad(k, ((0, 0), (0, Skp - Sk), (0, 0)))
        v = jnp.pad(v, ((0, 0), (0, Skp - Sk), (0, 0)))

    kernel = functools.partial(
        _flash_kernel, scale=scale, kv_len=Sk, needs_kv_mask=(Skp != Sk))
    cost = pl.CostEstimate(
        flops=4 * BH * Sqp * Skp * dk,
        transcendentals=BH * Sqp * Skp,
        bytes_accessed=(BH * (Sqp + 2 * Skp) * dk + BH * Sqp * dk)
        * q.dtype.itemsize,
    )
    out = pl.pallas_call(
        kernel,
        out_shape=jax.ShapeDtypeStruct((BH, Sqp, dk), q.dtype),
        grid_spec=pltpu.PrefetchScalarGridSpec(
            num_scalar_prefetch=0,
            grid=(BH, Sqp // tq, Skp // tk),
            in_specs=[
                pl.BlockSpec((1, tq, dk), lambda b, qi, ki: (b, qi, 0)),
                pl.BlockSpec((1, tk, dk), lambda b, qi, ki: (b, ki, 0)),
                pl.BlockSpec((1, tk, dk), lambda b, qi, ki: (b, ki, 0)),
            ],
            out_specs=pl.BlockSpec((1, tq, dk), lambda b, qi, ki: (b, qi, 0)),
            scratch_shapes=[
                pltpu.VMEM((1, tq, 1), jnp.float32),   # running max
                pltpu.VMEM((1, tq, 1), jnp.float32),   # running sum-exp
                pltpu.VMEM((1, tq, dk), jnp.float32),  # output accumulator
            ],
        ),
        compiler_params=pltpu.CompilerParams(
            dimension_semantics=("parallel", "parallel", "arbitrary"),
            vmem_limit_bytes=_VMEM_LIMIT,
        ),
        cost_estimate=cost,
    )(q, k, v)
    return out[:, :Sq, :]


# ---------------------------------------------------------------------------
# MultiHeadAttentionBlock forward (mask=None, eval mode)
# ---------------------------------------------------------------------------
@functools.partial(jax.jit, static_argnames=("h", "block_m", "block_q", "block_k"))
def multi_head_attention(q, k, v, wq, bq, wk, bk, wv, bv, wo, bo, *,
                         h, block_m=128, block_q=128, block_k=128):
    """q: (B, Sq, D), k/v: (B, Sk, D). Weights stored as (in, out) = PyTorch.T."""
    B, Sq, D = q.shape
    Sk = k.shape[1]
    d_k = D // h

    query = _linear(q.reshape(B * Sq, D), wq, bq, block_m=block_m)
    key = _linear(k.reshape(B * Sk, D), wk, bk, block_m=block_m)
    value = _linear(v.reshape(B * Sk, D), wv, bv, block_m=block_m)

    # (B, S, h, d_k) -> (B, h, S, d_k) -> (B*h, S, d_k)
    query = query.reshape(B, Sq, h, d_k).transpose(0, 2, 1, 3).reshape(B * h, Sq, d_k)
    key = key.reshape(B, Sk, h, d_k).transpose(0, 2, 1, 3).reshape(B * h, Sk, d_k)
    value = value.reshape(B, Sk, h, d_k).transpose(0, 2, 1, 3).reshape(B * h, Sk, d_k)

    ctx = _flash_attention(query, key, value, block_q=block_q, block_k=block_k)

    ctx = ctx.reshape(B, h, Sq, d_k).transpose(0, 2, 1, 3).reshape(B * Sq, D)
    out = _linear(ctx, wo, bo, block_m=block_m)
    return out.reshape(B, Sq, D)


# ---------------------------------------------------------------------------
# Parameter init (mirrors nn.Linear default U(-1/sqrt(in), 1/sqrt(in)))
# ---------------------------------------------------------------------------
def _init_linear(key, d_in, d_out):
    kw, kb = jax.random.split(key)
    bound = 1.0 / math.sqrt(d_in)
    w = jax.random.uniform(kw, (d_in, d_out), jnp.float32, -bound, bound)
    b = jax.random.uniform(kb, (d_out,), jnp.float32, -bound, bound)
    return w, b


def _reference(q, k, v, wq, bq, wk, bk, wv, bv, wo, bo, *, h):
    hp = jax.lax.Precision.HIGHEST
    B, Sq, D = q.shape
    Sk = k.shape[1]
    d_k = D // h
    query = jnp.einsum("bsd,de->bse", q, wq, precision=hp) + bq
    key = jnp.einsum("bsd,de->bse", k, wk, precision=hp) + bk
    value = jnp.einsum("bsd,de->bse", v, wv, precision=hp) + bv
    query = query.reshape(B, Sq, h, d_k).transpose(0, 2, 1, 3)
    key = key.reshape(B, Sk, h, d_k).transpose(0, 2, 1, 3)
    value = value.reshape(B, Sk, h, d_k).transpose(0, 2, 1, 3)
    scores = jnp.einsum("bhqd,bhkd->bhqk", query, key, precision=hp) / math.sqrt(d_k)
    probs = jax.nn.softmax(scores, axis=-1)
    ctx = jnp.einsum("bhqk,bhkd->bhqd", probs, value, precision=hp)
    ctx = ctx.transpose(0, 2, 1, 3).reshape(B, Sq, D)
    return jnp.einsum("bsd,de->bse", ctx, wo, precision=hp) + bo


if __name__ == "__main__":
    # d_model=32, h=4 (d_k=8), batch=2, seq=8, dropout=0.0 (eval mode)
    B, S, D, H = 2, 8, 32, 4
    key = jax.random.PRNGKey(0)
    kq, kk, kv_, k1, k2, k3, k4 = jax.random.split(key, 7)
    q = jax.random.normal(kq, (B, S, D), jnp.float32)
    k = jax.random.normal(kk, (B, S, D), jnp.float32)
    v = jax.random.normal(kv_, (B, S, D), jnp.float32)
    wq, bq = _init_linear(k1, D, D)
    wk, bk = _init_linear(k2, D, D)
    wv, bv = _init_linear(k3, D, D)
    wo, bo = _init_linear(k4, D, D)

    out = multi_head_attention(q, k, v, wq, bq, wk, bk, wv, bv, wo, bo, h=H)
    jax.block_until_ready(out)

    ref = _reference(q, k, v, wq, bq, wk, bk, wv, bv, wo, bo, h=H)
    assert out.shape == (B, S, D)
    err = float(jnp.max(jnp.abs(out - ref)))
    assert jnp.allclose(out, ref, atol=1e-4, rtol=1e-4), f"mismatch vs reference (max abs err {err})"

    print("KERNEL_OK")
</pallas_src>

<mosaic_0001>
module attributes {stable_mosaic.version = 11 : i64} {
  func.func @_linear_kernel(%arg0: i32, %arg1: memref<16x32xf32, #tpu.memory_space<vmem>>, %arg2: memref<32x32xf32, #tpu.memory_space<vmem>>, %arg3: memref<1x32xf32, #tpu.memory_space<vmem>>, %arg4: memref<16x32xf32, #tpu.memory_space<vmem>>) attributes {dimension_semantics = [#tpu.dimension_semantics<parallel>], iteration_bounds = array<i64: 1>, scalar_prefetch = 0 : i64, scratch_operands = 0 : i64, tpu.core_type = #tpu.core_type<tc>, window_params = [{transform_indices = @transform_0, window_bounds = array<i64: 16, 32>}, {pipeline_mode = #tpu.pipeline_mode<synchronous>, transform_indices = @transform_1, window_bounds = array<i64: 32, 32>}, {pipeline_mode = #tpu.pipeline_mode<synchronous>, transform_indices = @transform_2, window_bounds = array<i64: 1, 32>}, {transform_indices = @transform_3, window_bounds = array<i64: 16, 32>}]} {
    %c0 = arith.constant 0 : index
    %c0_0 = arith.constant 0 : index
    %0 = vector.load %arg1[%c0, %c0_0] : memref<16x32xf32, #tpu.memory_space<vmem>>, vector<16x32xf32>
    %c0_1 = arith.constant 0 : index
    %c0_2 = arith.constant 0 : index
    %1 = vector.load %arg2[%c0_1, %c0_2] : memref<32x32xf32, #tpu.memory_space<vmem>>, vector<32x32xf32>
    %cst = arith.constant dense<0.000000e+00> : vector<16x32xf32>
    %2 = tpu.matmul %0, %1, %cst {dimension_numbers = #tpu.dot_dimension_numbers<[1], [0], [0], [1], [0, 0, 1, 1], [], []>} : vector<16x32xf32>, vector<32x32xf32>, vector<16x32xf32> -> vector<16x32xf32>
    %c0_3 = arith.constant 0 : index
    %c0_4 = arith.constant 0 : index
    %3 = vector.load %arg3[%c0_3, %c0_4] : memref<1x32xf32, #tpu.memory_space<vmem>>, vector<1x32xf32>
    %4 = vector.broadcast %3 : vector<1x32xf32> to vector<16x32xf32>
    %5 = arith.addf %2, %4 : vector<16x32xf32>
    %c0_5 = arith.constant 0 : index
    %c0_6 = arith.constant 0 : index
    %6 = vector.load %arg4[%c0_5, %c0_6] : memref<16x32xf32, #tpu.memory_space<vmem>>, vector<16x32xf32>
    tpu.vector_store %arg4[%c0_5, %c0_6], %5 {strides = array<i32>} : memref<16x32xf32, #tpu.memory_space<vmem>>, vector<16x32xf32>,
    return
  }
  func.func @transform_0(%arg0: i32) -> (i32, i32) {
    %c0_i32 = arith.constant 0 : i32
    %c0_i32_0 = arith.constant 0 : i32
    return %arg0, %c0_i32 : i32, i32
  }
  func.func @transform_1(%arg0: i32) -> (i32, i32) {
    %c0_i32 = arith.constant 0 : i32
    %c0_i32_0 = arith.constant 0 : i32
    %c0_i32_1 = arith.constant 0 : i32
    return %c0_i32, %c0_i32_0 : i32, i32
  }
  func.func @transform_2(%arg0: i32) -> (i32, i32) {
    %c0_i32 = arith.constant 0 : i32
    %c0_i32_0 = arith.constant 0 : i32
    %c0_i32_1 = arith.constant 0 : i32
    return %c0_i32, %c0_i32_0 : i32, i32
  }
  func.func @transform_3(%arg0: i32) -> (i32, i32) {
    %c0_i32 = arith.constant 0 : i32
    %c0_i32_0 = arith.constant 0 : i32
    return %arg0, %c0_i32 : i32, i32
  }
}

module attributes {stable_mosaic.version = 11 : i64} {
  func.func @_linear_kernel(%arg0: i32, %arg1: memref<16x32xf32, #tpu.memory_space<vmem>>, %arg2: memref<32x32xf32, #tpu.memory_space<vmem>>, %arg3: memref<1x32xf32, #tpu.memory_space<vmem>>, %arg4: memref<16x32xf32, #tpu.memory_space<vmem>>) attributes {dimension_semantics = [#tpu.dimension_semantics<parallel>], iteration_bounds = array<i64: 1>, scalar_prefetch = 0 : i64, scratch_operands = 0 : i64, tpu.core_type = #tpu.core_type<tc>, window_params = [{transform_indices = @transform_0, window_bounds = array<i64: 16, 32>}, {pipeline_mode = #tpu.pipeline_mode<synchronous>, transform_indices = @transform_1, window_bounds = array<i64: 32, 32>}, {pipeline_mode = #tpu.pipeline_mode<synchronous>, transform_indices = @transform_2, window_bounds = array<i64: 1, 32>}, {transform_indices = @transform_3, window_bounds = array<i64: 16, 32>}]} {
    %c0 = arith.constant 0 : index
    %c0_0 = arith.constant 0 : index
    %0 = vector.load %arg1[%c0, %c0_0] : memref<16x32xf32, #tpu.memory_space<vmem>>, vector<16x32xf32>
    %c0_1 = arith.constant 0 : index
    %c0_2 = arith.constant 0 : index
    %1 = vector.load %arg2[%c0_1, %c0_2] : memref<32x32xf32, #tpu.memory_space<vmem>>, vector<32x32xf32>
    %cst = arith.constant dense<0.000000e+00> : vector<16x32xf32>
    %2 = tpu.matmul %0, %1, %cst {dimension_numbers = #tpu.dot_dimension_numbers<[1], [0], [0], [1], [0, 0, 1, 1], [], []>} : vector<16x32xf32>, vector<32x32xf32>, vector<16x32xf32> -> vector<16x32xf32>
    %c0_3 = arith.constant 0 : index
    %c0_4 = arith.constant 0 : index
    %3 = vector.load %arg3[%c0_3, %c0_4] : memref<1x32xf32, #tpu.memory_space<vmem>>, vector<1x32xf32>
    %4 = vector.broadcast %3 : vector<1x32xf32> to vector<16x32xf32>
    %5 = arith.addf %2, %4 : vector<16x32xf32>
    %c0_5 = arith.constant 0 : index
    %c0_6 = arith.constant 0 : index
    %6 = vector.load %arg4[%c0_5, %c0_6] : memref<16x32xf32, #tpu.memory_space<vmem>>, vector<16x32xf32>
    tpu.vector_store %arg4[%c0_5, %c0_6], %5 {strides = array<i32>} : memref<16x32xf32, #tpu.memory_space<vmem>>, vector<16x32xf32>,
    return
  }
  func.func @transform_0(%arg0: i32) -> (i32, i32) {
    %c0_i32 = arith.constant 0 : i32
    %c0_i32_0 = arith.constant 0 : i32
    return %arg0, %c0_i32 : i32, i32
  }
  func.func @transform_1(%arg0: i32) -> (i32, i32) {
    %c0_i32 = arith.constant 0 : i32
    %c0_i32_0 = arith.constant 0 : i32
    %c0_i32_1 = arith.constant 0 : i32
    return %c0_i32, %c0_i32_0 : i32, i32
  }
  func.func @transform_2(%arg0: i32) -> (i32, i32) {
    %c0_i32 = arith.constant 0 : i32
    %c0_i32_0 = arith.constant 0 : i32
    %c0_i32_1 = arith.constant 0 : i32
    return %c0_i32, %c0_i32_0 : i32, i32
  }
  func.func @transform_3(%arg0: i32) -> (i32, i32) {
    %c0_i32 = arith.constant 0 : i32
    %c0_i32_0 = arith.constant 0 : i32
    return %arg0, %c0_i32 : i32, i32
  }
}

module attributes {stable_mosaic.version = 11 : i64} {
  func.func @_linear_kernel(%arg0: i32, %arg1: memref<16x32xf32, #tpu.memory_space<vmem>>, %arg2: memref<32x32xf32, #tpu.memory_space<vmem>>, %arg3: memref<1x32xf32, #tpu.memory_space<vmem>>, %arg4: memref<16x32xf32, #tpu.memory_space<vmem>>) attributes {dimension_semantics = [#tpu.dimension_semantics<parallel>], iteration_bounds = array<i64: 1>, scalar_prefetch = 0 : i64, scratch_operands = 0 : i64, tpu.core_type = #tpu.core_type<tc>, window_params = [{transform_indices = @transform_0, window_bounds = array<i64: 16, 32>}, {pipeline_mode = #tpu.pipeline_mode<synchronous>, transform_indices = @transform_1, window_bounds = array<i64: 32, 32>}, {pipeline_mode = #tpu.pipeline_mode<synchronous>, transform_indices = @transform_2, window_bounds = array<i64: 1, 32>}, {transform_indices = @transform_3, window_bounds = array<i64: 16, 32>}]} {
    %c0 = arith.constant 0 : index
    %c0_0 = arith.constant 0 : index
    %0 = vector.load %arg1[%c0, %c0_0] : memref<16x32xf32, #tpu.memory_space<vmem>>, vector<16x32xf32>
    %c0_1 = arith.constant 0 : index
    %c0_2 = arith.constant 0 : index
    %1 = vector.load %arg2[%c0_1, %c0_2] : memref<32x32xf32, #tpu.memory_space<vmem>>, vector<32x32xf32>
    %cst = arith.constant dense<0.000000e+00> : vector<16x32xf32>
    %2 = tpu.matmul %0, %1, %cst {dimension_numbers = #tpu.dot_dimension_numbers<[1], [0], [0], [1], [0, 0, 1, 1], [], []>} : vector<16x32xf32>, vector<32x32xf32>, vector<16x32xf32> -> vector<16x32xf32>
    %c0_3 = arith.constant 0 : index
    %c0_4 = arith.constant 0 : index
    %3 = vector.load %arg3[%c0_3, %c0_4] : memref<1x32xf32, #tpu.memory_space<vmem>>, vector<1x32xf32>
    %4 = vector.broadcast %3 : vector<1x32xf32> to vector<16x32xf32>
    %5 = arith.addf %2, %4 : vector<16x32xf32>
    %c0_5 = arith.constant 0 : index
    %c0_6 = arith.constant 0 : index
    %6 = vector.load %arg4[%c0_5, %c0_6] : memref<16x32xf32, #tpu.memory_space<vmem>>, vector<16x32xf32>
    tpu.vector_store %arg4[%c0_5, %c0_6], %5 {strides = array<i32>} : memref<16x32xf32, #tpu.memory_space<vmem>>, vector<16x32xf32>,
    return
  }
  func.func @transform_0(%arg0: i32) -> (i32, i32) {
    %c0_i32 = arith.constant 0 : i32
    %c0_i32_0 = arith.constant 0 : i32
    return %arg0, %c0_i32 : i32, i32
  }
  func.func @transform_1(%arg0: i32) -> (i32, i32) {
    %c0_i32 = arith.constant 0 : i32
    %c0_i32_0 = arith.constant 0 : i32
    %c0_i32_1 = arith.constant 0 : i32
    return %c0_i32, %c0_i32_0 : i32, i32
  }
  func.func @transform_2(%arg0: i32) -> (i32, i32) {
    %c0_i32 = arith.constant 0 : i32
    %c0_i32_0 = arith.constant 0 : i32
    %c0_i32_1 = arith.constant 0 : i32
    return %c0_i32, %c0_i32_0 : i32, i32
  }
  func.func @transform_3(%arg0: i32) -> (i32, i32) {
    %c0_i32 = arith.constant 0 : i32
    %c0_i32_0 = arith.constant 0 : i32
    return %arg0, %c0_i32 : i32, i32
  }
}

module attributes {stable_mosaic.version = 11 : i64} {
  func.func @_flash_kernel(%arg0: i32, %arg1: i32, %arg2: i32, %arg3: memref<1x8x8xf32, #tpu.memory_space<vmem>>, %arg4: memref<1x8x8xf32, #tpu.memory_space<vmem>>, %arg5: memref<1x8x8xf32, #tpu.memory_space<vmem>>, %arg6: memref<1x8x8xf32, #tpu.memory_space<vmem>>, %arg7: memref<1x8x1xf32, #tpu.memory_space<vmem>>, %arg8: memref<1x8x1xf32, #tpu.memory_space<vmem>>, %arg9: memref<1x8x8xf32, #tpu.memory_space<vmem>>) attributes {dimension_semantics = [#tpu.dimension_semantics<parallel>, #tpu.dimension_semantics<parallel>, #tpu.dimension_semantics<arbitrary>], iteration_bounds = array<i64: 8, 1, 1>, scalar_prefetch = 0 : i64, scratch_operands = 3 : i64, tpu.core_type = #tpu.core_type<tc>, window_params = [{transform_indices = @transform_0, window_bounds = array<i64: 1, 8, 8>}, {transform_indices = @transform_1, window_bounds = array<i64: 1, 8, 8>}, {transform_indices = @transform_2, window_bounds = array<i64: 1, 8, 8>}, {transform_indices = @transform_3, window_bounds = array<i64: 1, 8, 8>}]} {
    %c0_i32 = arith.constant 0 : i32
    %0 = arith.cmpi eq, %arg2, %c0_i32 : i32
    %1 = arith.extui %0 : i1 to i32
    %c0_i32_0 = arith.constant 0 : i32
    %2 = arith.cmpi ne, %1, %c0_i32_0 : i32
    scf.if %2 {
      %cst_33 = arith.constant 0xFF800000 : f32
      %46 = vector.broadcast %cst_33 : f32 to vector<1x8x1xf32>
      %c0_34 = arith.constant 0 : index
      %c0_35 = arith.constant 0 : index
      %c0_36 = arith.constant 0 : index
      %47 = vector.load %arg7[%c0_34, %c0_35, %c0_36] : memref<1x8x1xf32, #tpu.memory_space<vmem>>, vector<1x8x1xf32>
      tpu.vector_store %arg7[%c0_34, %c0_35, %c0_36], %46 {strides = array<i32>} : memref<1x8x1xf32, #tpu.memory_space<vmem>>, vector<1x8x1xf32>,
      %cst_37 = arith.constant 0.000000e+00 : f32
      %48 = vector.broadcast %cst_37 : f32 to vector<1x8x1xf32>
      %c0_38 = arith.constant 0 : index
      %c0_39 = arith.constant 0 : index
      %c0_40 = arith.constant 0 : index
      %49 = vector.load %arg8[%c0_38, %c0_39, %c0_40] : memref<1x8x1xf32, #tpu.memory_space<vmem>>, vector<1x8x1xf32>
      tpu.vector_store %arg8[%c0_38, %c0_39, %c0_40], %48 {strides = array<i32>} : memref<1x8x1xf32, #tpu.memory_space<vmem>>, vector<1x8x1xf32>,
      %cst_41 = arith.constant 0.000000e+00 : f32
      %50 = vector.broadcast %cst_41 : f32 to vector<1x8x8xf32>
      %c0_42 = arith.constant 0 : index
      %c0_43 = arith.constant 0 : index
      %c0_44 = arith.constant 0 : index
      %51 = vector.load %arg9[%c0_42, %c0_43, %c0_44] : memref<1x8x8xf32, #tpu.memory_space<vmem>>, vector<1x8x8xf32>
      tpu.vector_store %arg9[%c0_42, %c0_43, %c0_44], %50 {strides = array<i32>} : memref<1x8x8xf32, #tpu.memory_space<vmem>>, vector<1x8x8xf32>,
    } else {
    }
    %c0 = arith.constant 0 : index
    %c0_1 = arith.constant 0 : index
    %c0_2 = arith.constant 0 : index
    %3 = vector.load %arg3[%c0, %c0_1, %c0_2] : memref<1x8x8xf32, #tpu.memory_space<vmem>>, vector<1x8x8xf32>
    %4 = vector.shape_cast %3 : vector<1x8x8xf32> to vector<8x8xf32>
    %c0_3 = arith.constant 0 : index
    %c0_4 = arith.constant 0 : index
    %c0_5 = arith.constant 0 : index
    %5 = vector.load %arg4[%c0_3, %c0_4, %c0_5] : memref<1x8x8xf32, #tpu.memory_space<vmem>>, vector<1x8x8xf32>
    %6 = vector.shape_cast %5 : vector<1x8x8xf32> to vector<8x8xf32>
    %c0_6 = arith.constant 0 : index
    %c0_7 = arith.constant 0 : index
    %c0_8 = arith.constant 0 : index
    %7 = vector.load %arg5[%c0_6, %c0_7, %c0_8] : memref<1x8x8xf32, #tpu.memory_space<vmem>>, vector<1x8x8xf32>
    %8 = vector.shape_cast %7 : vector<1x8x8xf32> to vector<8x8xf32>
    %cst = arith.constant dense<0.000000e+00> : vector<8x8xf32>
    %9 = tpu.matmul %4, %6, %cst {dimension_numbers = #tpu.dot_dimension_numbers<[1], [1], [0], [0], [0, 0, 1, 0], [], []>} : vector<8x8xf32>, vector<8x8xf32>, vector<8x8xf32> -> vector<8x8xf32>
    %cst_9 = arith.constant 0.353553385 : f32
    %10 = vector.broadcast %cst_9 : f32 to vector<8x8xf32>
    %11 = arith.mulf %9, %10 : vector<8x8xf32>
    %c0_10 = arith.constant 0 : index
    %c0_11 = arith.constant 0 : index
    %c0_12 = arith.constant 0 : index
    %12 = vector.load %arg7[%c0_10, %c0_11, %c0_12] : memref<1x8x1xf32, #tpu.memory_space<vmem>>, vector<1x8x1xf32>
    %13 = vector.shape_cast %12 : vector<1x8x1xf32> to vector<8x1xf32>
    %cst_13 = arith.constant dense<0xFF800000> : vector<8xf32>
    %14 = vector.multi_reduction <maximumf>, %11, %cst_13 [1] : vector<8x8xf32> to vector<8xf32>
    %15 = vector.shape_cast %14 : vector<8xf32> to vector<8x1xf32>
    %16 = arith.maximumf %13, %15 : vector<8x1xf32>
    %17 = arith.subf %13, %16 : vector<8x1xf32>
    %18 = math.exp %17 : vector<8x1xf32>
    %19 = vector.broadcast %16 : vector<8x1xf32> to vector<8x8xf32>
    %20 = arith.subf %11, %19 : vector<8x8xf32>
    %21 = math.exp %20 : vector<8x8xf32>
    %c0_14 = arith.constant 0 : index
    %c0_15 = arith.constant 0 : index
    %c0_16 = arith.constant 0 : index
    %22 = vector.load %arg8[%c0_14, %c0_15, %c0_16] : memref<1x8x1xf32, #tpu.memory_space<vmem>>, vector<1x8x1xf32>
    %23 = vector.shape_cast %22 : vector<1x8x1xf32> to vector<8x1xf32>
    %24 = arith.mulf %18, %23 : vector<8x1xf32>
    %cst_17 = arith.constant dense<0.000000e+00> : vector<8xf32>
    %25 = vector.multi_reduction <add>, %21, %cst_17 [1] : vector<8x8xf32> to vector<8xf32>
    %26 = vector.shape_cast %25 : vector<8xf32> to vector<8x1xf32>
    %27 = arith.addf %24, %26 : vector<8x1xf32>
    %c0_18 = arith.constant 0 : index
    %c0_19 = arith.constant 0 : index
    %c0_20 = arith.constant 0 : index
    %28 = vector.load %arg8[%c0_18, %c0_19, %c0_20] : memref<1x8x1xf32, #tpu.memory_space<vmem>>, vector<1x8x1xf32>
    %29 = vector.shape_cast %28 : vector<1x8x1xf32> to vector<8x1xf32>
    %30 = vector.shape_cast %27 : vector<8x1xf32> to vector<1x8x1xf32>
    tpu.vector_store %arg8[%c0_18, %c0_19, %c0_20], %30 {strides = array<i32>} : memref<1x8x1xf32, #tpu.memory_space<vmem>>, vector<1x8x1xf32>,
    %c0_21 = arith.constant 0 : index
    %c0_22 = arith.constant 0 : index
    %c0_23 = arith.constant 0 : index
    %31 = vector.load %arg9[%c0_21, %c0_22, %c0_23] : memref<1x8x8xf32, #tpu.memory_space<vmem>>, vector<1x8x8xf32>
    %32 = vector.shape_cast %31 : vector<1x8x8xf32> to vector<8x8xf32>
    %33 = vector.broadcast %18 : vector<8x1xf32> to vector<8x8xf32>
    %34 = arith.mulf %33, %32 : vector<8x8xf32>
    %cst_24 = arith.constant dense<0.000000e+00> : vector<8x8xf32>
    %35 = tpu.matmul %21, %8, %cst_24 {dimension_numbers = #tpu.dot_dimension_numbers<[1], [0], [0], [1], [0, 0, 1, 1], [], []>} : vector<8x8xf32>, vector<8x8xf32>, vector<8x8xf32> -> vector<8x8xf32>
    %36 = arith.addf %34, %35 : vector<8x8xf32>
    %c0_25 = arith.constant 0 : index
    %c0_26 = arith.constant 0 : index
    %c0_27 = arith.constant 0 : index
    %37 = vector.load %arg9[%c0_25, %c0_26, %c0_27] : memref<1x8x8xf32, #tpu.memory_space<vmem>>, vector<1x8x8xf32>
    %38 = vector.shape_cast %37 : vector<1x8x8xf32> to vector<8x8xf32>
    %39 = vector.shape_cast %36 : vector<8x8xf32> to vector<1x8x8xf32>
    tpu.vector_store %arg9[%c0_25, %c0_26, %c0_27], %39 {strides = array<i32>} : memref<1x8x8xf32, #tpu.memory_space<vmem>>, vector<1x8x8xf32>,
    %c0_28 = arith.constant 0 : index
    %c0_29 = arith.constant 0 : index
    %c0_30 = arith.constant 0 : index
    %40 = vector.load %arg7[%c0_28, %c0_29, %c0_30] : memref<1x8x1xf32, #tpu.memory_space<vmem>>, vector<1x8x1xf32>
    %41 = vector.shape_cast %40 : vector<1x8x1xf32> to vector<8x1xf32>
    %42 = vector.shape_cast %16 : vector<8x1xf32> to vector<1x8x1xf32>
    tpu.vector_store %arg7[%c0_28, %c0_29, %c0_30], %42 {strides = array<i32>} : memref<1x8x1xf32, #tpu.memory_space<vmem>>, vector<1x8x1xf32>,
    %c0_i32_31 = arith.constant 0 : i32
    %43 = arith.cmpi eq, %arg2, %c0_i32_31 : i32
    %44 = arith.extui %43 : i1 to i32
    %c0_i32_32 = arith.constant 0 : i32
    %45 = arith.cmpi ne, %44, %c0_i32_32 : i32
    scf.if %45 {
      %c0_33 = arith.constant 0 : index
      %c0_34 = arith.constant 0 : index
      %c0_35 = arith.constant 0 : index
      %46 = vector.load %arg9[%c0_33, %c0_34, %c0_35] : memref<1x8x8xf32, #tpu.memory_space<vmem>>, vector<1x8x8xf32>
      %47 = vector.shape_cast %46 : vector<1x8x8xf32> to vector<8x8xf32>
      %c0_36 = arith.constant 0 : index
      %c0_37 = arith.constant 0 : index
      %c0_38 = arith.constant 0 : index
      %48 = vector.load %arg8[%c0_36, %c0_37, %c0_38] : memref<1x8x1xf32, #tpu.memory_space<vmem>>, vector<1x8x1xf32>
      %49 = vector.shape_cast %48 : vector<1x8x1xf32> to vector<8x1xf32>
      %50 = vector.broadcast %49 : vector<8x1xf32> to vector<8x8xf32>
      %51 = arith.divf %47, %50 : vector<8x8xf32>
      %c0_39 = arith.constant 0 : index
      %c0_40 = arith.constant 0 : index
      %c0_41 = arith.constant 0 : index
      %52 = vector.load %arg6[%c0_39, %c0_40, %c0_41] : memref<1x8x8xf32, #tpu.memory_space<vmem>>, vector<1x8x8xf32>
      %53 = vector.shape_cast %52 : vector<1x8x8xf32> to vector<8x8xf32>
      %54 = vector.shape_cast %51 : vector<8x8xf32> to vector<1x8x8xf32>
      tpu.vector_store %arg6[%c0_39, %c0_40, %c0_41], %54 {strides = array<i32>} : memref<1x8x8xf32, #tpu.memory_space<vmem>>, vector<1x8x8xf32>,
    } else {
    }
    return
  }
  func.func @transform_0(%arg0: i32, %arg1: i32, %arg2: i32) -> (i32, i32, i32) {
    %c0_i32 = arith.constant 0 : i32
    %c0_i32_0 = arith.constant 0 : i32
    return %arg0, %arg1, %c0_i32 : i32, i32, i32
  }
  func.func @transform_1(%arg0: i32, %arg1: i32, %arg2: i32) -> (i32, i32, i32) {
    %c0_i32 = arith.constant 0 : i32
    %c0_i32_0 = arith.constant 0 : i32
    return %arg0, %arg2, %c0_i32 : i32, i32, i32
  }
  func.func @transform_2(%arg0: i32, %arg1: i32, %arg2: i32) -> (i32, i32, i32) {
    %c0_i32 = arith.constant 0 : i32
    %c0_i32_0 = arith.constant 0 : i32
    return %arg0, %arg2, %c0_i32 : i32, i32, i32
  }
  func.func @transform_3(%arg0: i32, %arg1: i32, %arg2: i32) -> (i32, i32, i32) {
    %c0_i32 = arith.constant 0 : i32
    %c0_i32_0 = arith.constant 0 : i32
    return %arg0, %arg1, %c0_i32 : i32, i32, i32
  }
}

</mosaic_0001>

<bundles_post_ra>
// kernel: multi_head_attention.5
= control target key start
LH: loop header
LB: loop body
LE: loop exit
PB: predicated region body
PF: predicated region fallthrough
CT: control target
= control target key end

     0   :  { %8 = vsyncpa [#allocation3], 0  ;;  %s235_s0 = inlined_call_operand.hbm [shape: f32[16,32], index: 0, kind: input, shape index: {}]   ;;  %s236_s1 = inlined_call_operand.hbm [shape: f32[32,32], index: 1, kind: input, shape index: {}]   ;;  %s237_s2 = inlined_call_operand.hbm [shape: f32[1,32], index: 2, kind: input, shape index: {}]   ;;  %s238_s3 = inlined_call_operand.vmem [shape: f32[16,32], index: 3, kind: output, shape index: {}]  }
   0x1   :  { %9 = vsyncpa [#allocation5], 0  ;;  %s27_s14 = sshll.u32 %s236_s1, 4  ;;  %s195_s15 = smov [#allocation4]   ;;  %s28_s14 = int_to_ptr.hbm [resolvable:$true] %s27_s14 }
   0x2   :  { %s29_s16 = sshll.u32 %s195_s15, 4  ;;  %s14_s19 = sshll.u32 %s235_s0, 4  ;;  %s30_s16 = int_to_ptr.vmem [resolvable:$true] %s29_s16  ;;  %s15_s19 = int_to_ptr.hbm [resolvable:$true] %s14_s19 }
   0x3   :  { %s196_s20 = smov 128   ;;  %s197_s21 = smov 8  }
   0x4   :  { %35 = dma.hbm_to_vmem [thread:$0]  %s28_s14, 512, %s30_s16, [#allocation5], %s196_s20, %s196_s20, %s197_s21  }
   0x5   :  { %s198_s22 = smov [#allocation2]   ;;  %s41_s26 = sshll.u32 %s237_s2, 4  ;;  %s42_s26 = int_to_ptr.hbm [resolvable:$true] %s41_s26 }
   0x6   :  { %s16_s23 = sshll.u32 %s198_s22, 4  ;;  %s199_s1 = smov [#allocation6]   ;;  %s17_s23 = int_to_ptr.vmem [resolvable:$true] %s16_s23 }
   0x7   :  { %22 = dma.hbm_to_vmem [thread:$0]  %s15_s19, 256, %s17_s23, [#allocation3], %s196_s20, %s196_s20, %s197_s21  }
   0x8   :  { %s43_s27 = sshll.u32 %s199_s1, 4  ;;  %s44_s27 = int_to_ptr.vmem [resolvable:$true] %s43_s27 }
   0x9   :  { %46 = dma.hbm_to_vmem [thread:$0]  %s42_s26, 16, %s44_s27, [#allocation5]  }
   0xa   :  { %191 = dma.done.wait [#allocation3], 256  }
   0xb   :  { %192 = vsyncadd [#allocation3], 4294967040 }
   0xc   :  { %193 = dma.done.wait [#allocation5], 528  }
   0xd   :  { %194 = vsyncadd [#allocation5], 4294966768  ;;  %v64_v0 = vld [vmem:[#allocation4 + $0x18] sm:$0xff]  ;;  %v63_v1 = vld [vmem:[#allocation4 + $0x10] sm:$0xff]  ;;  %vm69_vm0 = vcmask 261120  }
   0xe   :  { %88 = vmatpush.msra.mxu0 %v64_v0  ;;  %109 = vmatpush.msra.mxu1 %v64_v0  ;;  %v62_v2 = vld [vmem:[#allocation4 + $0x8] sm:$0xff]  ;;  %v61_v3 = vld [vmem:[#allocation4] sm:$0xff]  ;;  %v59_v4 = vld [vmem:[#allocation2] sm:$0xff] }
   0xf   :  { %v60_v5 = vld [vmem:[#allocation2 + $0x8] sm:$0xff]  ;;  %v118_v6 = vld [vmem:[#allocation6] ss:$0 sm:$0xff] }
  0x10   :  { %89 = vmatpush.msra.mxu0 %v63_v1  ;;  %110 = vmatpush.msra.mxu1 %v63_v1 }
  0x12   :  { %90 = vmatpush.msra.mxu0 %v62_v2  ;;  %111 = vmatpush.msra.mxu1 %v62_v2 }
  0x14   :  { %91 = vmatpush.msra.mxu0 %v61_v3  ;;  %112 = vmatpush.msra.mxu1 %v61_v3 }
  0x15   :  { %107 = vmatmul.msk.f32.vlgmr.msra.gmra.mxu0 %vm69_vm0, %v59_v4  ;;  %108 = vmatmul.msk.f32.vlgmr.msra.gmra.mxu1 %vm69_vm0, %v60_v5 }
  0x92   :  { %v93_v7 = vpop.f32.mrf.mxu0  ;;  %v96_v8 = vpop.f32.mrf.mxu1 }
  0x93   :  { %v94_v9 = vadd.f32 %v118_v6, %v93_v7  ;;  %v97_v10 = vadd.f32 %v118_v6, %v96_v8 }
  0x95   :  { %99 = vst.msk [vmem:[%s238_s3] sm:$0xff] %vm69_vm0, %v94_v9 }
  0x96   :  { %100 = vst.msk [vmem:[%s238_s3 + $0x8] sm:$0xff] %vm69_vm0, %v97_v10 }
  0x97   :  { %105 = vsyncpa [#allocation3], 1 }
  0x98   :  { %106 = vsyncpa [#allocation5], 1 }

// kernel: multi_head_attention.7
= control target key start
LH: loop header
LB: loop body
LE: loop exit
PB: predicated region body
PF: predicated region fallthrough
CT: control target
= control target key end

     0   :  { %8 = vsyncpa [#allocation3], 0  ;;  %s113_s15 = smov [#allocation2]   ;;  %s114_s17 = smov 128   ;;  %s160_s0 = inlined_call_operand.hbm [shape: f32[16,32], index: 0, kind: input, shape index: {}]   ;;  %s161_s1 = inlined_call_operand.vmem [shape: f32[32,32], index: 1, kind: input, shape index: {}]   ;;  %s162_s2 = inlined_call_operand.vmem [shape: f32[1,32], index: 2, kind: input, shape index: {}]   ;;  %s163_s3 = inlined_call_operand.vmem [shape: f32[16,32], index: 3, kind: output, shape index: {}]  }
   0x1   :  { %s13_s14 = sshll.u32 %s160_s0, 4  ;;  %s15_s16 = sshll.u32 %s113_s15, 4  ;;  %s14_s14 = int_to_ptr.hbm [resolvable:$true] %s13_s14  ;;  %s16_s16 = int_to_ptr.vmem [resolvable:$true] %s15_s16 }
   0x2   :  { %s115_s18 = smov 8  }
   0x3   :  { %21 = dma.hbm_to_vmem [thread:$0]  %s14_s14, 256, %s16_s16, [#allocation3], %s114_s17, %s114_s17, %s115_s18  }
   0x4   :  { %111 = dma.done.wait [#allocation3], 256  }
   0x5   :  { %112 = vsyncadd [#allocation3], 4294967040  ;;  %v35_v0 = vld [vmem:[%s161_s1 + $0x18] sm:$0xff]  ;;  %v34_v1 = vld [vmem:[%s161_s1 + $0x10] sm:$0xff]  ;;  %vm40_vm0 = vcmask 261120  }
   0x6   :  { %59 = vmatpush.msra.mxu0 %v35_v0  ;;  %79 = vmatpush.msra.mxu1 %v35_v0  ;;  %v33_v2 = vld [vmem:[%s161_s1 + $0x8] sm:$0xff]  ;;  %v32_v3 = vld [vmem:[%s161_s1] sm:$0xff] }
   0x7   :  { %v30_v4 = vld [vmem:[#allocation2] sm:$0xff]  ;;  %v31_v5 = vld [vmem:[#allocation2 + $0x8] sm:$0xff] }
   0x8   :  { %60 = vmatpush.msra.mxu0 %v34_v1  ;;  %80 = vmatpush.msra.mxu1 %v34_v1  ;;  %v86_v6 = vld [vmem:[%s162_s2] ss:$0 sm:$0xff] }
   0xa   :  { %61 = vmatpush.msra.mxu0 %v33_v2  ;;  %81 = vmatpush.msra.mxu1 %v33_v2 }
   0xc   :  { %62 = vmatpush.msra.mxu0 %v32_v3  ;;  %82 = vmatpush.msra.mxu1 %v32_v3 }
   0xd   :  { %77 = vmatmul.msk.f32.vlgmr.msra.gmra.mxu0 %vm40_vm0, %v30_v4  ;;  %78 = vmatmul.msk.f32.vlgmr.msra.gmra.mxu1 %vm40_vm0, %v31_v5 }
  0x8a   :  { %v64_v7 = vpop.f32.mrf.mxu0  ;;  %v67_v8 = vpop.f32.mrf.mxu1 }
  0x8b   :  { %v65_v9 = vadd.f32 %v86_v6, %v64_v7  ;;  %v68_v10 = vadd.f32 %v86_v6, %v67_v8 }
  0x8d   :  { %70 = vst.msk [vmem:[%s163_s3] sm:$0xff] %vm40_vm0, %v65_v9 }
  0x8e   :  { %71 = vst.msk [vmem:[%s163_s3 + $0x8] sm:$0xff] %vm40_vm0, %v68_v10 }
  0x8f   :  { %76 = vsyncpa [#allocation3], 1 }

// kernel: multi_head_attention.9
= control target key start
LH: loop header
LB: loop body
LE: loop exit
PB: predicated region body
PF: predicated region fallthrough
CT: control target
= control target key end

     0   :  { %s162_s0 = inlined_call_operand.vmem [shape: f32[16,32], index: 0, kind: input, shape index: {}]   ;;  %s163_s1 = inlined_call_operand.vmem [shape: f32[32,32], index: 1, kind: input, shape index: {}]   ;;  %s164_s2 = inlined_call_operand.vmem [shape: f32[1,32], index: 2, kind: input, shape index: {}]   ;;  %s165_s3 = inlined_call_operand.hbm [shape: f32[16,32], index: 3, kind: output, shape index: {}]  }
   0x1   :  { %v20_v0 = vld [vmem:[%s163_s1 + $0x18] sm:$0xff]  ;;  %v19_v1 = vld [vmem:[%s163_s1 + $0x10] sm:$0xff]  ;;  %v18_v2 = vld [vmem:[%s163_s1 + $0x8] sm:$0xff] }
   0x2   :  { %44 = vmatpush.msra.mxu0 %v20_v0  ;;  %77 = vmatpush.msra.mxu1 %v20_v0 }
   0x3   :  { %8 = vsyncpa [#allocation3], 0  ;;  %v17_v3 = vld [vmem:[%s163_s1] sm:$0xff]  ;;  %vm25_vm0 = vcmask 261120   ;;  %v16_v5 = vld [vmem:[%s162_s0 + $0x8] sm:$0xff]  ;;  %s111_s1 = smov [#allocation2]  }
   0x4   :  { %45 = vmatpush.msra.mxu0 %v19_v1  ;;  %78 = vmatpush.msra.mxu1 %v19_v1  ;;  %v15_v4 = vld [vmem:[%s162_s0] sm:$0xff]  ;;  %s61_s26 = sshll.u32 %s111_s1, 4  ;;  %s63_s29 = sshll.u32 %s165_s3, 4  ;;  %s62_s26 = int_to_ptr.vmem [resolvable:$true] %s61_s26  ;;  %s64_s29 = int_to_ptr.hbm [resolvable:$true] %s63_s29 }
   0x5   :  { %v84_v6 = vld [vmem:[%s164_s2] ss:$0 sm:$0xff]  ;;  %s112_s0 = smov 128   ;;  %s113_s30 = smov 8  }
   0x6   :  { %46 = vmatpush.msra.mxu0 %v18_v2  ;;  %79 = vmatpush.msra.mxu1 %v18_v2 }
   0x8   :  { %47 = vmatpush.msra.mxu0 %v17_v3  ;;  %80 = vmatpush.msra.mxu1 %v17_v3 }
   0x9   :  { %75 = vmatmul.msk.f32.vlgmr.msra.gmra.mxu0 %vm25_vm0, %v15_v4  ;;  %76 = vmatmul.msk.f32.vlgmr.msra.gmra.mxu1 %vm25_vm0, %v16_v5 }
  0x86   :  { %v49_v7 = vpop.f32.mrf.mxu0  ;;  %v52_v8 = vpop.f32.mrf.mxu1 }
  0x87   :  { %v50_v9 = vadd.f32 %v84_v6, %v49_v7  ;;  %v53_v10 = vadd.f32 %v84_v6, %v52_v8 }
  0x89   :  { %55 = vst.msk [vmem:[#allocation2] sm:$0xff] %vm25_vm0, %v50_v9 }
  0x8a   :  { %56 = vst.msk [vmem:[#allocation2 + $0x8] sm:$0xff] %vm25_vm0, %v53_v10 }
  0x8b   :  { %69 = dma.vmem_to_hbm [thread:$0]  %s62_s26, 256, %s64_s29, [#allocation3], %s112_s0, %s112_s0, %s113_s30  }
  0x8c   :  { %109 = dma.done.wait [#allocation3], 256  }
  0x8d   :  { %110 = vsyncadd [#allocation3], 4294967040 }
  0x8e   :  { %74 = vsyncpa [#allocation3], 1 }

// kernel: multi_head_attention.8
= control target key start
LH: loop header
LB: loop body
LE: loop exit
PB: predicated region body
PF: predicated region fallthrough
CT: control target
= control target key end

     0   :  { %s587_s12 = smov 0   ;;  %s589_s13 = smov 0   ;;  %s644_s0 = inlined_call_operand.vmem [shape: f32[8,8,8], index: 0, kind: input, shape index: {}]   ;;  %s645_s1 = inlined_call_operand.vmem [shape: f32[8,8,8], index: 1, kind: input, shape index: {}]   ;;  %s646_s2 = inlined_call_operand.vmem [shape: f32[8,8,8], index: 2, kind: input, shape index: {}]   ;;  %s647_s3 = inlined_call_operand.vmem [shape: f32[8,8,8], index: 3, kind: output, shape index: {}]  }
   0x1   :  { %s591_s14 = smov 0  }
   0x2 LB: > { %s32_s15 = sadd.s32 1, %s558_s13  ;;  %p494_p0 = scmp.ge.s32.totalorder %s562_s14, 1  ;;  %s562_s14 = sphi %s591_s14, %s13_s14   ;;  %s558_s13 = sphi %s589_s13, %s649_s13   ;;  %s554_s12 = sphi %s587_s12, %s648_s12  }
   0x3   : > { %p34_p1 = scmp.ge.s32.totalorder %s32_s15, 8  ;;  %p190_p2 = scmp.lt.s32.totalorder %s562_s14, 9 }
   0x5   : > { %s651_s15 = smov (%p34_p1, %s32_s15), 0  ;;  %p191_p3 = pnand %p494_p0, %p190_p2 }
   0x6   : > { %p232_p4 = scmp.lt.s32.totalorder (!%p191_p3), %s554_s12, 7 }
   0x7   : > { %194 = sbr.rel (%p191_p3) target bundleno = 654 (0x28e), region = 32 }
   0xc   : > { %vm267_vm0 = vcmask 64512   ;;  %v564_v0 = vmov 0.0   ;;  %s653_s12 = smov (!%p232_p4, %s554_s12), 7  ;;  %vm264_vm1 = vcmask 7168   ;;  %v565_v3 = vmov -inf  }
   0xd   : > { %268 = vst.msk [vmem:[#allocation4] sm:$0xff] %vm267_vm0, %v564_v0  ;;  %s606_s16 = sshll.u32 %s653_s12, 3  ;;  %v566_v7 = vmov 0  }
   0xe   : > { %s245_s19 = scalar_lea.vmem %s645_s1, %s606_s16  ;;  %s238_s22 = scalar_lea.vmem %s644_s0, %s606_s16  ;;  %265 = vst.msk [vmem:[#allocation2] sm:$0xff] %vm264_vm1, %v565_v3  ;;  %531 = vset.pattern.permute.xlu0 %v566_v7  ;;  %533 = vset.pattern.permute.xlu2 %v566_v7 }
   0xf   : > { %v270_v1 = vld [vmem:[%s245_s19] sm:$0xff]  ;;  %266 = vst.msk [vmem:[#allocation3] sm:$0xff] %vm264_vm1, %v564_v0  ;;  %532 = vset.pattern.permute.xlu1 %v566_v7  ;;  %s252_s25 = scalar_lea.vmem %s646_s2, %s606_s16  ;;  %s259_s28 = scalar_lea.vmem %s647_s3, %s606_s16 }
  0x10   : > { %499 = vmatpush.xpose.msk.msra.mxu0 %vm267_vm0, %v270_v1  ;;  %v269_v2 = vld [vmem:[%s238_s22] sm:$0xff] }
  0x11   : > { %v271_v14 = vld [vmem:[%s252_s25] sm:$0xff] }
  0x12   : > { %349 = vmatpush.msra.mxu1 %v271_v14 }
  0x13   : > { %500 = vmatmul.msk.f32.vlgmr.msra.gmra.mxu0 %vm267_vm0, %v269_v2 }
  0x14   : > { %v324_v24 = vld [vmem:[#allocation4] sm:$0xff] }
  0x15   : > { %v300_v8 = vld [vmem:[#allocation2] sm:$0xff] }
  0x16   : > { %v316_v20 = vld [vmem:[#allocation3] sm:$0xff] }
  0x90   : > { %v296_v4 = vpop.f32.mrf.mxu0 }
  0x91   : > { %v299_v5 = vmul.f32 0.35355338, %v296_v4 }
  0x93   : > { %v301_v6 = vsel %vm267_vm0, %v299_v5, -inf }
  0x94   : > { %302 = vmax.xlane.f32.xlu0 %v301_v6 }
 0x107   : > { %v303_v9 = vpop.xlane.xlu0 %302 }
 0x108   : > { %v304_v10 = vmax.f32 %v300_v8, %v303_v9 }
 0x10a   : > { %v305_v11 = vsub.f32 %v300_v8, %v304_v10  ;;  %356 = vst.msk [vmem:[#allocation2] sm:$0xff] %vm264_vm1, %v304_v10  ;;  %310 = vperm.xlu0 %531, %v304_v10  }
 0x10c   : > { %v306_v12 = vmul.f32 1.442695, %v305_v11 }
 0x10e   : > { %534 = vpow2.f32 %v306_v12 }
 0x114   : > { %v535_v13 = vpop.eup %534 }
 0x115   : > { %327 = vperm.xlu2 %533, %v535_v13   ;;  %v317_v21 = vmul.f32 %v535_v13, %v316_v20 }
 0x16f   : > { %v328_v25 = vpop.permute.xlu2 %327 }
 0x170   : > { %v330_v26 = vmul.f32 %v328_v25, %v324_v24 }
 0x17c   : > { %v311_v15 = vpop.permute.xlu0 %310 }
 0x17d   : > { %v313_v16 = vsub.f32 %v299_v5, %v311_v15 }
 0x17f   : > { %v314_v17 = vmul.f32 1.442695, %v313_v16 }
 0x181   : > { %536 = vpow2.f32 %v314_v17 }
 0x187   : > { %v537_v18 = vpop.eup %536 }
 0x188   : > { %501 = vmatmul.msk.f32.vlgmr.msra.gmra.mxu1 %vm267_vm0, %v537_v18  ;;  %v318_v19 = vsel %vm267_vm0, %v537_v18, 0.0 }
 0x189   : > { %319 = vadd.xlane.f32.xlu1 %v318_v19 }
 0x1fc   : > { %v320_v22 = vpop.xlane.xlu1 %319 }
 0x1fd   : > { %v321_v23 = vadd.f32 %v320_v22, %v317_v21 }
 0x1ff   : > { %323 = vst.msk [vmem:[#allocation3] sm:$0xff] %vm264_vm1, %v321_v23 }
 0x205   : > { %v351_v27 = vpop.f32.mrf.mxu1 }
 0x206   : > { %v354_v28 = vadd.f32 %v351_v27, %v330_v26  ;;  %v361_v29 = vld [vmem:[#allocation3] sm:$0xff] }
 0x207   : > { %364 = vperm.xlu1 %532, %v361_v29  }
 0x208   : > { %355 = vst.msk [vmem:[#allocation4] sm:$0xff] %vm267_vm0, %v354_v28 }
 0x20f   : > { %v360_v40 = vld [vmem:[#allocation4] sm:$0xff] }
 0x279   : > { %v365_v30 = vpop.permute.xlu1 %364 }
 0x27a   : > { %538 = vrcp.f32 %v365_v30  ;;  %v378_v34 = vand.u32 2147483648, %v365_v30  ;;  %v376_v36 = vand.u32 2147483647, %v365_v30  ;;  %vm372_vm3 = vweird.f32 %v365_v30 }
 0x27c   : > { %v379_v38 = vor.u32 1.1754944e-38, %v378_v34  ;;  %vm377_vm5 = vcmp.eq.f32.partialorder %v376_v36, 8.507059e+37 }
 0x280   : > { %v539_v31 = vpop.eup %538 }
 0x281   : > { %v368_v32 = vmul.f32 %v539_v31, %v365_v30  ;;  %vm373_vm2 = vweird.f32 %v539_v31 }
 0x282   : > { %vm374_vm4 = vmor %vm372_vm3, %vm373_vm2 }
 0x283   : > { %v369_v33 = vsub.f32 1.0, %v368_v32 }
 0x285   : > { %v370_v35 = vmul.f32 %v539_v31, %v369_v33 }
 0x287   : > { %v371_v37 = vadd.f32 %v539_v31, %v370_v35 }
 0x289   : > { %v375_v39 = vsel %vm374_vm4, %v539_v31, %v371_v37 }
 0x28a   : > { %v380_v41 = vsel %vm377_vm5, %v379_v38, %v375_v39 }
 0x28b   : > { %v381_v42 = vmul.f32 %v380_v41, %v360_v40 }
 0x28d   : > { %382 = vst.msk [vmem:[%s259_s28] sm:$0xff] %vm267_vm0, %v381_v42 }
 0x28e PF: > { %s13_s14 = sadd.s32 1, %s562_s14   ;;  %s648_s12 = smov %s558_s13 }
 0x28f   : > { %p10_p5 = scmp.ge.s32.totalorder %s13_s14, 10   ;;  %s649_s13 = smov %s651_s15 }
 0x291   :  { %12 = sbr.rel (!%p10_p5) target bundleno = 2 (0x2), region = 76 }

</bundles_post_ra>
